<compile_context>
chip_gen: v5e
topology: v5e:2x2
jax: 0.10.0
libtpu: 0.0.40
codegen_flags: <defaults>
</compile_context>

<pallas_src>
import functools

import jax
import jax.numpy as jnp
from jax.experimental import pallas as pl
from jax.experimental.pallas import tpu as pltpu


_GAMMA = -0.1
_ZETA = 1.1

_SMEM_SPEC = pl.BlockSpec(memory_space=pltpu.MemorySpace.SMEM)


# ----------------------------------------------------------------------------
# Pallas kernels
# ----------------------------------------------------------------------------
def _init_alpha_kernel(w_ref, params_ref, alpha_ref):
    """alpha = -log((zeta-gamma)/(rest-gamma) - 1), rest = w/delta - floor(w/delta)."""
    delta = params_ref[0]
    w = w_ref[...]
    xd = w / delta
    rest = xd - jnp.floor(xd)
    alpha_ref[...] = -jnp.log((_ZETA - _GAMMA) / (rest - _GAMMA) - 1.0)


def _adaround_fwd_kernel(x_ref, alpha_ref, params_ref, o_ref, *,
                         n_levels, round_mode, soft_targets):
    delta = params_ref[0]
    zero_point = params_ref[1]
    x = x_ref[...]
    xd = x / delta

    if round_mode in ("nearest", "nearest_ste"):
        # STE only changes the backward pass; forward numerics are plain rounding.
        x_int = jnp.round(xd)
    elif round_mode == "learned_hard_sigmoid":
        x_floor = jnp.floor(xd)
        alpha = alpha_ref[...]
        if soft_targets:
            h = jnp.clip(jax.nn.sigmoid(alpha) * (_ZETA - _GAMMA) + _GAMMA, 0.0, 1.0)
        else:
            h = jnp.where(alpha >= 0.0, 1.0, 0.0)
        x_int = x_floor + h
    else:
        # TODO(synk): 'stochastic' round mode needs torch.bernoulli-style sampling
        # (could use pltpu.prng_* / stateful_bernoulli); not implemented here.
        raise ValueError(f"unsupported round_mode: {round_mode}")

    x_quant = jnp.clip(x_int + zero_point, 0.0, float(n_levels - 1))
    o_ref[...] = ((x_quant - zero_point) * delta).astype(o_ref.dtype)


# ----------------------------------------------------------------------------
# Tiled elementwise launcher
# ----------------------------------------------------------------------------
def _round_up(v, m):
    return ((v + m - 1) // m) * m


def _tile_plan(n):
    """Lane-dense 2-D tiling for a flattened elementwise problem of n elements."""
    cols = 512 if n >= 512 else 128          # multiple of 128 lanes -> unmasked stores
    rows = -(-n // cols)
    tm = min(512, _round_up(rows, 8))        # big row tiles amortize grid-step overhead
    rows_p = _round_up(rows, tm)
    return rows_p, cols, tm, cols


def _to_tiles(v, rows_p, cols):
    flat = v.reshape(-1).astype(jnp.float32)
    pad = rows_p * cols - flat.shape[0]
    if pad:
        flat = jnp.pad(flat, (0, pad))
    return flat.reshape(rows_p, cols)


def _elementwise_pallas(kernel, arrays, params, n):
    """Run kernel(*array_refs, params_ref, o_ref) over a tiled flattened layout."""
    rows_p, cols, tm, tn = _tile_plan(n)
    tiled = [_to_tiles(a, rows_p, cols) for a in arrays]
    grid = (rows_p // tm, cols // tn)
    vspec = pl.BlockSpec((tm, tn), lambda i, j: (i, j))
    out = pl.pallas_call(
        kernel,
        out_shape=jax.ShapeDtypeStruct((rows_p, cols), jnp.float32),
        grid=grid,
        in_specs=[vspec] * len(tiled) + [_SMEM_SPEC],
        out_specs=vspec,
        compiler_params=pltpu.CompilerParams(
            dimension_semantics=("parallel", "parallel")),
    )(*tiled, params)
    return out.reshape(-1)[:n]


# ----------------------------------------------------------------------------
# Module-level API (mirrors UniformAffineQuantizer init + AdaRoundQuantizer)
# ----------------------------------------------------------------------------
def uniform_affine_init(w, n_bits=8):
    """'max' scale method, asymmetric, not channel-wise.  Returns f32[2] = [delta, zp].

    This is one-time init-time work (global min/max reduction), done in plain JAX.
    """
    n_levels = 2 ** n_bits
    x_min = jnp.minimum(jnp.min(w), 0.0)
    x_max = jnp.maximum(jnp.max(w), 0.0)
    delta = (x_max - x_min) / float(n_levels - 1)
    delta = jnp.maximum(delta, 1e-8)
    zero_point = jnp.round(-x_min / delta)
    return jnp.stack([delta, zero_point]).astype(jnp.float32)


def init_alpha(w, params):
    """AdaRoundQuantizer.init_alpha (learned_hard_sigmoid) as a Pallas kernel."""
    flat = _elementwise_pallas(_init_alpha_kernel, [w], params, w.size)
    return flat.reshape(w.shape)


def adaround_forward(x, alpha, params, *, n_bits=8,
                     round_mode="learned_hard_sigmoid", soft_targets=False):
    """AdaRoundQuantizer.forward as a single fused elementwise Pallas kernel."""
    n_levels = 2 ** n_bits
    kernel = functools.partial(_adaround_fwd_kernel, n_levels=n_levels,
                               round_mode=round_mode, soft_targets=soft_targets)
    flat = _elementwise_pallas(kernel, [x, alpha], params, x.size)
    return flat.reshape(x.shape).astype(x.dtype)


# ----------------------------------------------------------------------------
# Self-test
# ----------------------------------------------------------------------------
if __name__ == "__main__":
    key = jax.random.PRNGKey(0)
    wkey, _ = jax.random.split(key)

    n_bits = 8
    n_levels = 2 ** n_bits
    # Small conv-style weight tensor (AdaRound quantizes layer weights).
    w = jax.random.normal(wkey, (32, 16, 3, 3), jnp.float32) * 0.1

    # __init__ behavior: UAQ scale init + alpha init.
    params = uniform_affine_init(w, n_bits=n_bits)          # [delta, zero_point]
    alpha = jax.jit(init_alpha)(w, params)

    fwd_hard = jax.jit(functools.partial(
        adaround_forward, n_bits=n_bits,
        round_mode="learned_hard_sigmoid", soft_targets=False))
    fwd_soft = jax.jit(functools.partial(
        adaround_forward, n_bits=n_bits,
        round_mode="learned_hard_sigmoid", soft_targets=True))

    y_hard = jax.block_until_ready(fwd_hard(w, alpha, params))
    y_soft = jax.block_until_ready(fwd_soft(w, alpha, params))

    # Plain-JAX reference for numerical checking.
    delta, zp = params[0], params[1]

    def ref(x, soft):
        x_floor = jnp.floor(x / delta)
        if soft:
            h = jnp.clip(jax.nn.sigmoid(alpha) * (_ZETA - _GAMMA) + _GAMMA, 0.0, 1.0)
        else:
            h = (alpha >= 0.0).astype(jnp.float32)
        xq = jnp.clip(x_floor + h + zp, 0.0, float(n_levels - 1))
        return (xq - zp) * delta

    assert y_hard.shape == w.shape and y_soft.shape == w.shape
    assert bool(jnp.all(jnp.isfinite(y_hard)))
    assert bool(jnp.all(jnp.isfinite(y_soft)))
    assert bool(jnp.allclose(y_hard, ref(w, False), atol=1e-5, rtol=1e-5))
    assert bool(jnp.allclose(y_soft, ref(w, True), atol=1e-5, rtol=1e-5))
    print("KERNEL_OK")
</pallas_src>

<mosaic_0001>
module attributes {stable_mosaic.version = 11 : i64} {
  func.func @_init_alpha_kernel(%arg0: i32, %arg1: i32, %arg2: memref<16x512xf32, #tpu.memory_space<vmem>>, %arg3: memref<2xf32, #tpu.memory_space<smem>>, %arg4: memref<16x512xf32, #tpu.memory_space<vmem>>) attributes {dimension_semantics = [#tpu.dimension_semantics<parallel>, #tpu.dimension_semantics<parallel>], iteration_bounds = array<i64: 1, 1>, scalar_prefetch = 0 : i64, scratch_operands = 0 : i64, tpu.core_type = #tpu.core_type<tc>, window_params = [{transform_indices = @transform_0, window_bounds = array<i64: 16, 512>}, {transform_indices = @transform_1, window_bounds = array<i64: 2>}, {transform_indices = @transform_2, window_bounds = array<i64: 16, 512>}]} {
    %c0 = arith.constant 0 : index
    %0 = memref.load %arg3[%c0] : memref<2xf32, #tpu.memory_space<smem>>
    %c0_0 = arith.constant 0 : index
    %c0_1 = arith.constant 0 : index
    %1 = vector.load %arg2[%c0_0, %c0_1] : memref<16x512xf32, #tpu.memory_space<vmem>>, vector<16x512xf32>
    %2 = vector.broadcast %0 : f32 to vector<16x512xf32>
    %3 = arith.divf %1, %2 : vector<16x512xf32>
    %4 = math.floor %3 : vector<16x512xf32>
    %5 = arith.subf %3, %4 : vector<16x512xf32>
    %cst = arith.constant -1.000000e-01 : f32
    %6 = vector.broadcast %cst : f32 to vector<16x512xf32>
    %7 = arith.subf %5, %6 : vector<16x512xf32>
    %cst_2 = arith.constant 1.200000e+00 : f32
    %8 = vector.broadcast %cst_2 : f32 to vector<16x512xf32>
    %9 = arith.divf %8, %7 : vector<16x512xf32>
    %cst_3 = arith.constant 1.000000e+00 : f32
    %10 = vector.broadcast %cst_3 : f32 to vector<16x512xf32>
    %11 = arith.subf %9, %10 : vector<16x512xf32>
    %12 = math.log %11 : vector<16x512xf32>
    %cst_4 = arith.constant 0.000000e+00 : f32
    %13 = vector.broadcast %cst_4 : f32 to vector<16x512xf32>
    %14 = arith.subf %13, %12 : vector<16x512xf32>
    %c0_5 = arith.constant 0 : index
    %c0_6 = arith.constant 0 : index
    %15 = vector.load %arg4[%c0_5, %c0_6] : memref<16x512xf32, #tpu.memory_space<vmem>>, vector<16x512xf32>
    tpu.vector_store %arg4[%c0_5, %c0_6], %14 {strides = array<i32>} : memref<16x512xf32, #tpu.memory_space<vmem>>, vector<16x512xf32>,
    return
  }
  func.func @transform_0(%arg0: i32, %arg1: i32) -> (i32, i32) {
    %c0_i32 = arith.constant 0 : i32
    return %arg0, %arg1 : i32, i32
  }
  func.func @transform_1(%arg0: i32, %arg1: i32) -> i32 {
    %c0_i32 = arith.constant 0 : i32
    %c0_i32_0 = arith.constant 0 : i32
    return %c0_i32 : i32
  }
  func.func @transform_2(%arg0: i32, %arg1: i32) -> (i32, i32) {
    %c0_i32 = arith.constant 0 : i32
    return %arg0, %arg1 : i32, i32
  }
}

</mosaic_0001>

<bundles_post_ra>
// kernel: init_alpha.1
= control target key start
LH: loop header
LB: loop body
LE: loop exit
PB: predicated region body
PF: predicated region fallthrough
CT: control target
= control target key end

     0   :  { %7 = vsyncpa [#allocation3], 0  ;;  %s310_s12 = smov [#allocation2]   ;;  %s538_s0 = inlined_call_operand.vmem [shape: f32[16,512], index: 0, kind: input, shape index: {}]   ;;  %s539_s1 = inlined_call_operand.vmem [shape: f32[2], index: 1, kind: input, shape index: {}]   ;;  %s540_s2 = inlined_call_operand.vmem [shape: f32[16,512], index: 2, kind: output, shape index: {}]  }
   0x1   :  { %s15_s11 = sshll.u32 %s539_s1, 4  ;;  %s16_s11 = int_to_ptr.vmem [resolvable:$true] %s15_s11 }
   0x2   :  { %18 = dma.vmem_to_smem %s16_s11, 16, %s310_s12, [#allocation3]  }
   0x3   :  { %308 = dma.done.wait [#allocation3], 16  }
   0x4   :  { %309 = vsyncadd [#allocation3], 4294967280 }
   0x5   :  { %23 = sfence }
   0x6   :  { %s24_s13 = sld [smem:[#allocation2]]  ;;  %v25_v8 = vld [vmem:[%s538_s0] sm:$0xff]  ;;  %v26_v10 = vld [vmem:[%s538_s0 + $0x8] sm:$0xff]  ;;  %v27_v11 = vld [vmem:[%s538_s0 + $0x10] sm:$0xff] }
   0x7   :  { %v28_v12 = vld [vmem:[%s538_s0 + $0x18] sm:$0xff]  ;;  %v29_v13 = vld [vmem:[%s538_s0 + $0x20] sm:$0xff]  ;;  %v30_v15 = vld [vmem:[%s538_s0 + $0x28] sm:$0xff] }
   0x8   :  { %v31_v16 = vld [vmem:[%s538_s0 + $0x30] sm:$0xff]  ;;  %v32_v17 = vld [vmem:[%s538_s0 + $0x38] sm:$0xff] }
   0xc   :  { %v33_v0 = vstv %s24_s13 }
   0xd   :  { %262 = vrcp.f32 %v33_v0  ;;  %v45_v3 = vand.u32 2147483648, %v33_v0  ;;  %vm39_vm0 = vweird.f32 %v33_v0  ;;  %v43_v5 = vand.u32 2147483647, %v33_v0 }
   0xf   :  { %v46_v7 = vor.u32 1.1754944e-38, %v45_v3  ;;  %vm44_vm3 = vcmp.eq.f32.partialorder %v43_v5, 8.507059e+37 }
  0x13   :  { %v263_v1 = vpop.eup %262 }
  0x14   :  { %v35_v2 = vmul.f32 %v263_v1, %v33_v0  ;;  %vm40_vm1 = vweird.f32 %v263_v1 }
  0x15   :  { %vm41_vm2 = vmor %vm39_vm0, %vm40_vm1 }
  0x16   :  { %v36_v4 = vsub.f32 1.0, %v35_v2 }
  0x18   :  { %v37_v6 = vmul.f32 %v263_v1, %v36_v4 }
  0x1a   :  { %v38_v9 = vadd.f32 %v263_v1, %v37_v6 }
  0x1c   :  { %v42_v14 = vsel %vm41_vm2, %v263_v1, %v38_v9 }
  0x1d   :  { %v47_v18 = vsel %vm44_vm3, %v46_v7, %v42_v14 }
  0x1e   :  { %v48_v19 = vmul.f32 %v47_v18, %v25_v8  ;;  %v49_v20 = vmul.f32 %v47_v18, %v26_v10  ;;  %v50_v21 = vmul.f32 %v47_v18, %v27_v11  ;;  %v51_v22 = vmul.f32 %v47_v18, %v28_v12 }
  0x1f   :  { %v52_v23 = vmul.f32 %v47_v18, %v29_v13  ;;  %v53_v24 = vmul.f32 %v47_v18, %v30_v15  ;;  %v54_v25 = vmul.f32 %v47_v18, %v31_v16  ;;  %v55_v26 = vmul.f32 %v47_v18, %v32_v17 }
  0x20   :  { %v56_v27 = vfloor.f32 %v48_v19  ;;  %v57_v28 = vfloor.f32 %v49_v20  ;;  %v58_v29 = vfloor.f32 %v50_v21  ;;  %v59_v30 = vfloor.f32 %v51_v22 }
  0x21   :  { %v60_v31 = vfloor.f32 %v52_v23  ;;  %v61_v32 = vfloor.f32 %v53_v24  ;;  %v62_v33 = vfloor.f32 %v54_v25  ;;  %v63_v39 = vfloor.f32 %v55_v26 }
  0x22   :  { %v64_v34 = vsub.f32 %v48_v19, %v56_v27  ;;  %v65_v35 = vsub.f32 %v49_v20, %v57_v28  ;;  %v66_v36 = vsub.f32 %v50_v21, %v58_v29  ;;  %v67_v37 = vsub.f32 %v51_v22, %v59_v30 }
  0x23   :  { %v68_v38 = vsub.f32 %v52_v23, %v60_v31  ;;  %v69_v43 = vsub.f32 %v53_v24, %v61_v32  ;;  %v70_v46 = vsub.f32 %v54_v25, %v62_v33  ;;  %v71_v52 = vsub.f32 %v55_v26, %v63_v39 }
  0x24   :  { %v245_v40 = vadd.f32 0.1, %v64_v34  ;;  %v353_v41 = vadd.f32 0.1, %v65_v35  ;;  %v355_v42 = vadd.f32 0.1, %v66_v36 }
  0x25   :  { %v357_v45 = vadd.f32 0.1, %v67_v37  ;;  %v361_v49 = vadd.f32 0.1, %v68_v38  ;;  %v365_v51 = vadd.f32 0.1, %v69_v43 }
  0x26   :  { %264 = vrcp.f32 %v245_v40  ;;  %v91_v44 = vand.u32 2147483648, %v245_v40  ;;  %v89_v47 = vand.u32 2147483647, %v245_v40  ;;  %v106_v48 = vand.u32 2147483648, %v353_v41 }
  0x27   :  { %266 = vrcp.f32 %v353_v41  ;;  %v104_v50 = vand.u32 2147483647, %v353_v41  ;;  %vm85_vm4 = vweird.f32 %v245_v40  ;;  %vm100_vm5 = vweird.f32 %v353_v41 }
  0x28   :  { %268 = vrcp.f32 %v355_v42  ;;  %v119_v53 = vand.u32 2147483647, %v355_v42  ;;  %v121_v54 = vand.u32 2147483648, %v355_v42  ;;  %v370_v55 = vor.u32 1.1754944e-38, %v91_v44 }
  0x29   :  { %vm115_vm6 = vweird.f32 %v355_v42  ;;  %270 = vrcp.f32 %v357_v45  ;;  %v136_v56 = vand.u32 2147483648, %v357_v45  ;;  %vm375_vm7 = vcmp.eq.f32.partialorder %v89_v47, 8.507059e+37 }
  0x2a   :  { %v379_v58 = vor.u32 1.1754944e-38, %v106_v48  ;;  %v134_v59 = vand.u32 2147483647, %v357_v45  ;;  %272 = vrcp.f32 %v361_v49  ;;  %vm384_vm9 = vcmp.eq.f32.partialorder %v104_v50, 8.507059e+37 }
  0x2b   :  { %v388_v62 = vor.u32 1.1754944e-38, %v121_v54  ;;  %v149_v63 = vand.u32 2147483647, %v361_v49  ;;  %v151_v0 = vand.u32 2147483648, %v361_v49  ;;  %vm393_vm12 = vcmp.eq.f32.partialorder %v119_v53, 8.507059e+37 }
  0x2c   :  { %v265_v60 = vpop.eup %264  ;;  %v397_v4 = vor.u32 1.1754944e-38, %v136_v56  ;;  %274 = vrcp.f32 %v365_v51  ;;  %vm405_vm0 = vcmp.eq.f32.partialorder %v134_v59, 8.507059e+37  ;;  %v164_v11 = vand.u32 2147483647, %v365_v51 }
  0x2d   :  { %v267_v1 = vpop.eup %266  ;;  %v81_v2 = vmul.f32 %v265_v60, %v245_v40  ;;  %vm86_vm11 = vweird.f32 %v265_v60  ;;  %v401_v7 = vor.u32 1.1754944e-38, %v151_v0  ;;  %vm410_vm1 = vcmp.eq.f32.partialorder %v149_v63, 8.507059e+37 }
  0x2e   :  { %v269_v5 = vpop.eup %268  ;;  %v96_v6 = vmul.f32 %v267_v1, %v353_v41  ;;  %vm101_vm13 = vweird.f32 %v267_v1  ;;  %v166_v15 = vand.u32 2147483648, %v365_v51  ;;  %v415_v16 = vadd.f32 0.1, %v70_v46  ;;  %vm422_vm3 = vmor %vm85_vm4, %vm86_vm11 }
  0x2f   :  { %v82_v8 = vsub.f32 1.0, %v81_v2  ;;  %v111_v9 = vmul.f32 %v269_v5, %v355_v42  ;;  %vm116_vm15 = vweird.f32 %v269_v5  ;;  %v271_v12 = vpop.eup %270  ;;  %v417_v17 = vadd.f32 0.1, %v71_v52  ;;  %vm434_vm8 = vmor %vm100_vm5, %vm101_vm13 }
  0x30   :  { %v97_v13 = vsub.f32 1.0, %v96_v6  ;;  %v273_v18 = vpop.eup %272  ;;  %v126_v21 = vmul.f32 %v271_v12, %v357_v45  ;;  %vm131_vm2 = vweird.f32 %v271_v12  ;;  %vm427_vm10 = vcmp.eq.f32.partialorder %v164_v11, 8.507059e+37  ;;  %vm441_vm4 = vmor %vm115_vm6, %vm116_vm15 }
  0x31   :  { %v83_v19 = vmul.f32 %v265_v60, %v82_v8  ;;  %v112_v20 = vsub.f32 1.0, %v111_v9  ;;  %v141_v24 = vmul.f32 %v273_v18, %v361_v49  ;;  %vm146_vm14 = vweird.f32 %v273_v18 }
  0x32   :  { %v98_v23 = vmul.f32 %v267_v1, %v97_v13  ;;  %v275_v26 = vpop.eup %274  ;;  %v127_v30 = vsub.f32 1.0, %v126_v21  ;;  %v167_v31 = vor.u32 1.1754944e-38, %v166_v15  ;;  %276 = vrcp.f32 %v415_v16 }
  0x33   :  { %v84_v27 = vadd.f32 %v265_v60, %v83_v19  ;;  %v113_v29 = vmul.f32 %v269_v5, %v112_v20  ;;  %v142_v34 = vsub.f32 1.0, %v141_v24  ;;  %v156_v35 = vmul.f32 %v275_v26, %v365_v51 }
  0x34   :  { %v99_v32 = vadd.f32 %v267_v1, %v98_v23  ;;  %vm161_vm11 = vweird.f32 %v275_v26  ;;  %v128_v38 = vmul.f32 %v271_v12, %v127_v30  ;;  %vm559_vm5 = vweird.f32 %v357_v45 }
  0x35   :  { %v88_v36 = vsel %vm422_vm3, %v265_v60, %v84_v27  ;;  %v114_v37 = vadd.f32 %v269_v5, %v113_v29  ;;  %vm457_vm6 = vmor %vm559_vm5, %vm131_vm2  ;;  %v143_v42 = vmul.f32 %v273_v18, %v142_v34  ;;  %v157_v43 = vsub.f32 1.0, %v156_v35 }
  0x36   :  { %v93_v39 = vsel %vm375_vm7, %v370_v55, %v88_v36  ;;  %v103_v40 = vsel %vm434_vm8, %v267_v1, %v99_v32  ;;  %v129_v48 = vadd.f32 %v271_v12, %v128_v38  ;;  %vm562_vm7 = vweird.f32 %v361_v49 }
  0x37   :  { %v94_v44 = vmul.f32 1.2, %v93_v39  ;;  %v108_v46 = vsel %vm384_vm9, %v379_v58, %v103_v40  ;;  %v118_v47 = vsel %vm441_vm4, %v269_v5, %v114_v37  ;;  %vm469_vm8 = vmor %vm562_vm7, %vm146_vm14  ;;  %v144_v53 = vadd.f32 %v273_v18, %v143_v42 }
  0x38   :  { %v109_v50 = vmul.f32 1.2, %v108_v46  ;;  %v123_v52 = vsel %vm393_vm12, %v388_v62, %v118_v47  ;;  %v158_v54 = vmul.f32 %v275_v26, %v157_v43  ;;  %v133_v57 = vsel %vm457_vm6, %v271_v12, %v129_v48  ;;  %v277_v62 = vpop.eup %276 }
  0x39   :  { %v253_v55 = vadd.f32 -1.0, %v94_v44  ;;  %v124_v56 = vmul.f32 1.2, %v123_v52  ;;  %vm565_vm9 = vweird.f32 %v365_v51  ;;  %vm175_vm14 = vweird.f32 %v415_v16 }
  0x3a   :  { %vm481_vm13 = vmor %vm565_vm9, %vm161_vm11  ;;  %v254_v58 = vadd.f32 -1.0, %v109_v50  ;;  %v138_v59 = vsel %vm405_vm0, %v397_v4, %v133_v57  ;;  %v148_v60 = vsel %vm469_vm8, %v273_v18, %v144_v53  ;;  %v159_v61 = vadd.f32 %v275_v26, %v158_v54 }
  0x3b   :  { %278 = vlog2.f32 %v253_v55  ;;  %v255_v63 = vadd.f32 -1.0, %v124_v56  ;;  %v139_v0 = vmul.f32 1.2, %v138_v59  ;;  %v153_v51 = vsel %vm410_vm1, %v401_v7, %v148_v60 }
  0x3c   :  { %280 = vlog2.f32 %v254_v58  ;;  %v154_v1 = vmul.f32 1.2, %v153_v51  ;;  %v163_v2 = vsel %vm481_vm13, %v275_v26, %v159_v61  ;;  %v171_v3 = vmul.f32 %v277_v62, %v415_v16 }
  0x3d   :  { %282 = vlog2.f32 %v255_v63  ;;  %v256_v4 = vadd.f32 -1.0, %v139_v0  ;;  %v168_v5 = vsel %vm427_vm10, %v167_v31, %v163_v2  ;;  %vm176_vm12 = vweird.f32 %v277_v62 }
  0x3e   :  { %v257_v6 = vadd.f32 -1.0, %v154_v1  ;;  %v169_v8 = vmul.f32 1.2, %v168_v5  ;;  %v172_v9 = vsub.f32 1.0, %v171_v3  ;;  %v179_v10 = vand.u32 2147483647, %v415_v16  ;;  %vm503_vm15 = vmor %vm175_vm14, %vm176_vm12 }
  0x3f   :  { %284 = vlog2.f32 %v256_v4  ;;  %v181_v7 = vand.u32 2147483648, %v415_v16  ;;  %vm190_vm0 = vweird.f32 %v417_v17  ;;  %v196_v40 = vand.u32 2147483648, %v417_v17 }
  0x40   :  { %286 = vlog2.f32 %v257_v6  ;;  %v258_v11 = vadd.f32 -1.0, %v169_v8  ;;  %v173_v12 = vmul.f32 %v277_v62, %v172_v9  ;;  %vm180_vm10 = vcmp.eq.f32.partialorder %v179_v10, 8.507059e+37 }
  0x41   :  { %v279_v13 = vpop.eup %278  ;;  %v182_v15 = vor.u32 1.1754944e-38, %v181_v7  ;;  %288 = vrcp.f32 %v417_v17  ;;  %v194_v42 = vand.u32 2147483647, %v417_v17  ;;  %v197_v46 = vor.u32 1.1754944e-38, %v196_v40 }
  0x42   :  { %v281_v18 = vpop.eup %280  ;;  %v209_v19 = vmul.f32 0.6931472, %v279_v13  ;;  %290 = vlog2.f32 %v258_v11  ;;  %v174_v20 = vadd.f32 %v277_v62, %v173_v12 }
  0x43   :  { %v283_v21 = vpop.eup %282  ;;  %v211_v22 = vmul.f32 0.6931472, %v281_v18  ;;  %vm195_vm3 = vcmp.eq.f32.partialorder %v194_v42, 8.507059e+37 }
  0x44   :  { %v224_v23 = vsub.f32 0.0, %v209_v19  ;;  %v213_v24 = vmul.f32 0.6931472, %v283_v21  ;;  %v178_v25 = vsel %vm503_vm15, %v277_v62, %v174_v20 }
  0x45   :  { %v285_v16 = vpop.eup %284  ;;  %v225_v26 = vsub.f32 0.0, %v211_v22  ;;  %v183_v27 = vsel %vm180_vm10, %v182_v15, %v178_v25 }
  0x46   :  { %v287_v28 = vpop.eup %286  ;;  %232 = vst [vmem:[%s540_s2] sm:$0xff] %v224_v23  ;;  %v226_v29 = vsub.f32 0.0, %v213_v24  ;;  %v215_v30 = vmul.f32 0.6931472, %v285_v16  ;;  %v184_v31 = vmul.f32 1.2, %v183_v27 }
  0x47   :  { %v289_v32 = vpop.eup %288  ;;  %233 = vst [vmem:[%s540_s2 + $0x8] sm:$0xff] %v225_v26  ;;  %v217_v33 = vmul.f32 0.6931472, %v287_v28 }
  0x48   :  { %v291_v34 = vpop.eup %290  ;;  %234 = vst [vmem:[%s540_s2 + $0x10] sm:$0xff] %v226_v29  ;;  %v227_v35 = vsub.f32 0.0, %v215_v30  ;;  %v259_v36 = vadd.f32 -1.0, %v184_v31  ;;  %v186_v37 = vmul.f32 %v289_v32, %v417_v17  ;;  %vm191_vm1 = vweird.f32 %v289_v32 }
  0x49   :  { %v228_v38 = vsub.f32 0.0, %v217_v33  ;;  %v219_v39 = vmul.f32 0.6931472, %v291_v34  ;;  %vm192_vm2 = vmor %vm190_vm0, %vm191_vm1 }
  0x4a   :  { %235 = vst [vmem:[%s540_s2 + $0x18] sm:$0xff] %v227_v35  ;;  %292 = vlog2.f32 %v259_v36  ;;  %v187_v41 = vsub.f32 1.0, %v186_v37 }
  0x4b   :  { %236 = vst [vmem:[%s540_s2 + $0x20] sm:$0xff] %v228_v38  ;;  %v229_v43 = vsub.f32 0.0, %v219_v39 }
  0x4c   :  { %v188_v44 = vmul.f32 %v289_v32, %v187_v41 }
  0x4d   :  { %237 = vst [vmem:[%s540_s2 + $0x28] sm:$0xff] %v229_v43 }
  0x4e   :  { %v189_v47 = vadd.f32 %v289_v32, %v188_v44 }
  0x50   :  { %v293_v48 = vpop.eup %292  ;;  %v193_v45 = vsel %vm192_vm2, %v289_v32, %v189_v47 }
  0x51   :  { %v221_v50 = vmul.f32 0.6931472, %v293_v48  ;;  %v198_v52 = vsel %vm195_vm3, %v197_v46, %v193_v45 }
  0x52   :  { %v199_v53 = vmul.f32 1.2, %v198_v52 }
  0x53   :  { %v230_v17 = vsub.f32 0.0, %v221_v50 }
  0x54   :  { %v260_v54 = vadd.f32 -1.0, %v199_v53 }
  0x55   :  { %238 = vst [vmem:[%s540_s2 + $0x30] sm:$0xff] %v230_v17 }
  0x56   :  { %294 = vlog2.f32 %v260_v54 }
  0x5c   :  { %v295_v55 = vpop.eup %294 }
  0x5d   :  { %v223_v56 = vmul.f32 0.6931472, %v295_v55 }
  0x5f   :  { %v231_v57 = vsub.f32 0.0, %v223_v56 }
  0x61   :  { %239 = vst [vmem:[%s540_s2 + $0x38] sm:$0xff] %v231_v57 }
  0x62   :  { %244 = vsyncpa [#allocation3], 1 }

</bundles_post_ra>
